<compile_context>
chip_gen: v6e
topology: v6e:2x2x1
jax: 0.10.0
libtpu: 0.0.40
codegen_flags: <defaults>
</compile_context>

<pallas_src>
from functools import partial

import jax
import jax.numpy as jnp
from jax import lax
from jax.experimental import pallas as pl
from jax.experimental.pallas import tpu as pltpu

EPS = 1e-5


# --------------------------------------------------------------------------- #
# Pallas kernels: grid = (M-tiles, K-tiles), f32 accumulator scratch (P3 style)
# --------------------------------------------------------------------------- #

def _act(y, a_bit):
    """Activate(a_bit): ReLU at 32 bit, DoReFa-style clamp+quantize otherwise."""
    if a_bit == 32:
        return jnp.maximum(y, 0.0)
    n = float(2 ** a_bit - 1)
    y = jnp.clip(y, 0.0, 1.0)
    return jnp.floor(y * n + 0.5) * (1.0 / n)


def _conv_bn_act_kernel(x_ref, w_ref, b_ref, o_ref, acc_ref, *, a_bit):
    """o = act1( x @ w_folded + bn0_bias )   (bn0 scale pre-folded into w)."""
    k = pl.program_id(1)

    @pl.when(k == 0)
    def _init():
        acc_ref[...] = jnp.zeros_like(acc_ref)

    acc_ref[...] += jnp.dot(x_ref[...], w_ref[...],
                            preferred_element_type=jnp.float32)

    @pl.when(k == pl.num_programs(1) - 1)
    def _done():
        o_ref[...] = _act(acc_ref[...] + b_ref[...], a_bit).astype(o_ref.dtype)


def _conv_res_bn_kernel(x_ref, w_ref, r_ref, s_ref, b_ref, o_ref, acc_ref):
    """o = (x @ w + residual) * bn1_scale + bn1_bias   (identity shortcut)."""
    k = pl.program_id(1)

    @pl.when(k == 0)
    def _init():
        acc_ref[...] = r_ref[...].astype(jnp.float32)

    acc_ref[...] += jnp.dot(x_ref[...], w_ref[...],
                            preferred_element_type=jnp.float32)

    @pl.when(k == pl.num_programs(1) - 1)
    def _done():
        o_ref[...] = (acc_ref[...] * s_ref[...] + b_ref[...]).astype(o_ref.dtype)


def _conv_scut_bn_kernel(x_ref, w_ref, xs_ref, ws_ref, bs_ref, s_ref, b_ref,
                         o_ref, acc_ref):
    """o = (x @ w + xs @ ws_folded + bns_bias) * bn1_scale + bn1_bias.

    The downsample 1x1 stride-s shortcut conv (+ its BN, folded into ws/bs) is
    fused here, so the (M, planes) shortcut tensor never touches HBM.
    """
    k = pl.program_id(1)

    @pl.when(k == 0)
    def _init():
        acc_ref[...] = (jnp.dot(xs_ref[...], ws_ref[...],
                                preferred_element_type=jnp.float32) + bs_ref[...])

    acc_ref[...] += jnp.dot(x_ref[...], w_ref[...],
                            preferred_element_type=jnp.float32)

    @pl.when(k == pl.num_programs(1) - 1)
    def _done():
        o_ref[...] = (acc_ref[...] * s_ref[...] + b_ref[...]).astype(o_ref.dtype)


# --------------------------------------------------------------------------- #
# Launcher
# --------------------------------------------------------------------------- #

def _round_up(x, m):
    return (x + m - 1) // m * m


def _pick_tk(k):
    if k <= 1024:
        return k                      # full-width K (small/medium layers)
    for tk in (1024, 512, 256, 128):  # K-tiled accumulator for wide layers
        if k % tk == 0:
            return tk
    return k  # TODO(synk): pad K when a very wide layer's K is not 128-aligned.


def _fused_mm(kernel_fn, x2d, w, extras, out_dtype):
    """Row-tiled, K-tiled fused matmul launcher.

    extras: list of (array, kind). kind == "rows": (M, c) operand tiled with the
    output rows; kind == "full": small operand resident as a single block.
    Kernel ref order: x, w, *extras, out, f32 accumulator scratch.
    """
    M, K = x2d.shape
    Cout = w.shape[1]
    TM = 512 if M >= 512 else _round_up(M, 8)   # big row tiles, no "TM = M" bomb
    TK = _pick_tk(K)
    Mp = _round_up(M, TM)

    def pad_rows(a):
        return a if a.shape[0] == Mp else jnp.pad(a, ((0, Mp - a.shape[0]), (0, 0)))

    args = [pad_rows(x2d), w]
    in_specs = [pl.BlockSpec((TM, TK), lambda i, k: (i, k)),
                pl.BlockSpec((TK, Cout), lambda i, k: (k, 0))]
    for a, kind in extras:
        assert a.ndim == 2
        if kind == "rows":
            args.append(pad_rows(a))
            in_specs.append(pl.BlockSpec((TM, a.shape[1]), lambda i, k: (i, 0)))
        else:  # "full"
            args.append(a)
            in_specs.append(pl.BlockSpec(a.shape, lambda i, k: (0, 0)))

    out = pl.pallas_call(
        kernel_fn,
        out_shape=jax.ShapeDtypeStruct((Mp, Cout), out_dtype),
        grid=(Mp // TM, K // TK),
        in_specs=in_specs,
        out_specs=pl.BlockSpec((TM, Cout), lambda i, k: (i, 0)),
        scratch_shapes=[pltpu.VMEM((TM, Cout), jnp.float32)],
        compiler_params=pltpu.CompilerParams(
            dimension_semantics=("parallel", "arbitrary"),
            vmem_limit_bytes=48 * 1024 * 1024),
    )(*args)
    return out[:M]


# --------------------------------------------------------------------------- #
# Glue (plain JAX): BN folding, quantizers, im2col
# --------------------------------------------------------------------------- #

def fold_bn(bn):
    scale = bn["gamma"] / jnp.sqrt(bn["var"] + EPS)
    return scale, bn["beta"] - bn["mean"] * scale


def activate(x, a_bit):
    if a_bit == 32:
        return jax.nn.relu(x)
    n = float(2 ** a_bit - 1)
    x = jnp.clip(x, 0.0, 1.0)
    return jnp.floor(x * n + 0.5) / n


def quantize_weight(w, w_bit):
    if w_bit == 32:
        return w
    n = float(2 ** w_bit - 1)
    t = jnp.tanh(w)
    t = t / (2.0 * jnp.max(jnp.abs(t))) + 0.5
    return 2.0 * (jnp.floor(t * n + 0.5) / n) - 1.0


def im2col_3x3(x, stride):
    """x: (N, H, W, C) -> (N*Ho*Wo, 9*C), patch order (kh, kw, cin)."""
    N, H, W, C = x.shape
    Ho = (H - 1) // stride + 1
    Wo = (W - 1) // stride + 1
    xp = jnp.pad(x, ((0, 0), (1, 1), (1, 1), (0, 0)))
    patches = []
    for kh in range(3):
        for kw in range(3):
            patches.append(
                lax.slice(
                    xp,
                    (0, kh, kw, 0),
                    (N, kh + (Ho - 1) * stride + 1, kw + (Wo - 1) * stride + 1, C),
                    (1, stride, stride, 1),
                )
            )
    cols = jnp.stack(patches, axis=3)              # (N, Ho, Wo, 9, C)
    return cols.reshape(N * Ho * Wo, 9 * C), Ho, Wo


# --------------------------------------------------------------------------- #
# BasicBlock_Q forward (Pallas)
# --------------------------------------------------------------------------- #

def basicblock_forward(x_nchw, p, stride, a_bit=32, w_bit=32):
    x = jnp.transpose(x_nchw, (0, 2, 3, 1)).astype(jnp.float32)   # -> NHWC
    N, H, W, Cin = x.shape
    planes = p["w0"].shape[-1]

    # act0 + im2col for conv0 (activations carried in bf16 -> half the im2col HBM traffic)
    a0 = activate(x, a_bit).astype(jnp.bfloat16)
    cols0, Ho, Wo = im2col_3x3(a0, stride)
    M = N * Ho * Wo

    # conv0 + bn0 (scale folded into bf16 weights) + act1, fused in one kernel.
    s0, b0 = fold_bn(p["bn0"])
    w0 = quantize_weight(p["w0"], w_bit).reshape(9 * Cin, planes)
    w0f = (w0 * s0[None, :]).astype(jnp.bfloat16)
    a1 = _fused_mm(
        partial(_conv_bn_act_kernel, a_bit=a_bit), cols0, w0f,
        [(b0.reshape(1, planes).astype(jnp.float32), "full")],
        jnp.bfloat16)                                             # (M, planes) bf16

    cols1, _, _ = im2col_3x3(a1.reshape(N, Ho, Wo, planes), 1)

    # conv1 + shortcut + bn1, fused in one kernel.
    w1 = quantize_weight(p["w1"], w_bit).reshape(9 * planes, planes).astype(jnp.bfloat16)
    s1, b1 = fold_bn(p["bn1"])
    s1 = s1.reshape(1, planes).astype(jnp.float32)
    b1 = b1.reshape(1, planes).astype(jnp.float32)

    if "ws" in p:
        # Downsample shortcut: plain (un-quantized) 1x1 stride-s conv + BN on RAW x.
        ss, bs = fold_bn(p["bns"])
        wsf = (p["ws"] * ss[None, :]).astype(jnp.bfloat16)
        xs = x[:, ::stride, ::stride, :]
        assert xs.shape[1:3] == (Ho, Wo)
        xs = xs.reshape(M, Cin).astype(jnp.bfloat16)
        out2d = _fused_mm(
            _conv_scut_bn_kernel, cols1, w1,
            [(xs, "rows"), (wsf, "full"),
             (bs.reshape(1, planes).astype(jnp.float32), "full"),
             (s1, "full"), (b1, "full")],
            jnp.float32)
    else:
        # Identity shortcut on RAW x (valid only when shapes match).
        assert stride == 1 and Cin == planes
        res = x.reshape(M, Cin).astype(jnp.bfloat16)
        out2d = _fused_mm(
            _conv_res_bn_kernel, cols1, w1,
            [(res, "rows"), (s1, "full"), (b1, "full")],
            jnp.float32)

    out = out2d.reshape(N, Ho, Wo, planes)
    return jnp.transpose(out, (0, 3, 1, 2))                       # -> NCHW


# --------------------------------------------------------------------------- #
# Deterministic parameter init + pure-JAX reference
# --------------------------------------------------------------------------- #

def init_params(key, in_planes, planes, stride):
    ks = jax.random.split(key, 6)

    def bn_params(k, c):
        k1, k2, k3, k4 = jax.random.split(k, 4)
        return dict(
            gamma=jax.random.uniform(k1, (c,), jnp.float32, 0.5, 1.5),
            beta=0.1 * jax.random.normal(k2, (c,), jnp.float32),
            mean=0.1 * jax.random.normal(k3, (c,), jnp.float32),
            var=jax.random.uniform(k4, (c,), jnp.float32, 0.5, 1.5),
        )

    p = {
        "w0": 0.2 * jax.random.normal(ks[0], (3, 3, in_planes, planes), jnp.float32),
        "bn0": bn_params(ks[1], planes),
        "w1": 0.2 * jax.random.normal(ks[2], (3, 3, planes, planes), jnp.float32),
        "bn1": bn_params(ks[3], planes),
    }
    if stride != 1 or in_planes != planes:      # expansion == 1
        p["ws"] = 0.2 * jax.random.normal(ks[4], (in_planes, planes), jnp.float32)
        p["bns"] = bn_params(ks[5], planes)
    return p


def reference_forward(x_nchw, p, stride, a_bit=32, w_bit=32):
    """lax.conv based reference, mirroring the kernels' bf16-in/f32-accum policy."""
    x = jnp.transpose(x_nchw, (0, 2, 3, 1)).astype(jnp.float32)
    dn = ("NHWC", "HWIO", "NHWC")

    def bn(y, b):
        return (y - b["mean"]) / jnp.sqrt(b["var"] + EPS) * b["gamma"] + b["beta"]

    def conv(inp, w, s, pad):
        return lax.conv_general_dilated(
            inp.astype(jnp.bfloat16), w.astype(jnp.bfloat16), (s, s), pad,
            dimension_numbers=dn, preferred_element_type=jnp.float32)

    a0 = activate(x, a_bit)
    o = bn(conv(a0, quantize_weight(p["w0"], w_bit), stride, ((1, 1), (1, 1))), p["bn0"])
    a1 = activate(o, a_bit)
    o = conv(a1, quantize_weight(p["w1"], w_bit), 1, ((1, 1), (1, 1)))
    if "ws" in p:
        ws = p["ws"].reshape(1, 1, *p["ws"].shape)
        sc = bn(conv(x, ws, stride, "VALID"), p["bns"])
    else:
        sc = x
    return jnp.transpose(bn(o + sc, p["bn1"]), (0, 3, 1, 2))


# --------------------------------------------------------------------------- #
# main
# --------------------------------------------------------------------------- #

if __name__ == "__main__":
    fwd = jax.jit(basicblock_forward, static_argnums=(2, 3, 4))
    N, H, W = 2, 16, 16

    # Config 1: downsample shortcut (stride 2, channel change), full precision.
    in_planes, planes, stride = 4, 16, 2
    x = jax.random.normal(jax.random.PRNGKey(0), (N, in_planes, H, W), jnp.float32)
    params = init_params(jax.random.PRNGKey(1), in_planes, planes, stride)
    out = jax.block_until_ready(fwd(x, params, stride, 32, 32))
    ref = reference_forward(x, params, stride, 32, 32)
    assert out.shape == ref.shape == (N, planes, H // stride, W // stride)
    # bf16 matmul operands vs (mirrored-precision) reference -> loose tolerance.
    assert jnp.allclose(out, ref, atol=5e-2, rtol=5e-2), "mismatch (downsample config)"

    # Config 2: identity shortcut (stride 1, in_planes == planes).
    in_planes2, planes2, stride2 = 16, 16, 1
    x2 = jax.random.normal(jax.random.PRNGKey(2), (N, in_planes2, H, W), jnp.float32)
    params2 = init_params(jax.random.PRNGKey(3), in_planes2, planes2, stride2)
    out2 = jax.block_until_ready(fwd(x2, params2, stride2, 32, 32))
    ref2 = reference_forward(x2, params2, stride2, 32, 32)
    assert out2.shape == ref2.shape == (N, planes2, H, W)
    assert jnp.allclose(out2, ref2, atol=5e-2, rtol=5e-2), "mismatch (identity config)"

    # Config 3: 4-bit quantized path (DoReFa-style assumption) -- smoke test only,
    # since the exact quantizer of the original repo is not specified.
    out3 = jax.block_until_ready(fwd(x, params, stride, 4, 4))
    assert out3.shape == ref.shape and bool(jnp.all(jnp.isfinite(out3)))

    print("KERNEL_OK")
</pallas_src>

<mosaic_0001>
module attributes {stable_mosaic.version = 11 : i64} {
  func.func @_conv_bn_act_kernel(%arg0: i32, %arg1: i32, %arg2: memref<128x36xbf16, #tpu.memory_space<vmem>>, %arg3: memref<36x16xbf16, #tpu.memory_space<vmem>>, %arg4: memref<1x16xf32, #tpu.memory_space<vmem>>, %arg5: memref<128x16xbf16, #tpu.memory_space<vmem>>, %arg6: memref<128x16xf32, #tpu.memory_space<vmem>>) attributes {dimension_semantics = [#tpu.dimension_semantics<parallel>, #tpu.dimension_semantics<arbitrary>], iteration_bounds = array<i64: 1, 1>, scalar_prefetch = 0 : i64, scratch_operands = 1 : i64, tpu.core_type = #tpu.core_type<tc>, window_params = [{transform_indices = @transform_0, window_bounds = array<i64: 128, 36>}, {transform_indices = @transform_1, window_bounds = array<i64: 36, 16>}, {pipeline_mode = #tpu.pipeline_mode<synchronous>, transform_indices = @transform_2, window_bounds = array<i64: 1, 16>}, {transform_indices = @transform_3, window_bounds = array<i64: 128, 16>}]} {
    %c0_i32 = arith.constant 0 : i32
    %0 = arith.cmpi eq, %arg1, %c0_i32 : i32
    %1 = arith.extui %0 : i1 to i32
    %c0_i32_0 = arith.constant 0 : i32
    %2 = arith.cmpi ne, %1, %c0_i32_0 : i32
    scf.if %2 {
      %cst_10 = arith.constant 0.000000e+00 : f32
      %12 = vector.broadcast %cst_10 : f32 to vector<128x16xf32>
      %c0_11 = arith.constant 0 : index
      %c0_12 = arith.constant 0 : index
      %13 = vector.load %arg6[%c0_11, %c0_12] : memref<128x16xf32, #tpu.memory_space<vmem>>, vector<128x16xf32>
      tpu.vector_store %arg6[%c0_11, %c0_12], %12 {strides = array<i32>} : memref<128x16xf32, #tpu.memory_space<vmem>>, vector<128x16xf32>,
    } else {
    }
    %c0 = arith.constant 0 : index
    %c0_1 = arith.constant 0 : index
    %3 = vector.load %arg6[%c0, %c0_1] : memref<128x16xf32, #tpu.memory_space<vmem>>, vector<128x16xf32>
    %c0_2 = arith.constant 0 : index
    %c0_3 = arith.constant 0 : index
    %4 = vector.load %arg2[%c0_2, %c0_3] : memref<128x36xbf16, #tpu.memory_space<vmem>>, vector<128x36xbf16>
    %c0_4 = arith.constant 0 : index
    %c0_5 = arith.constant 0 : index
    %5 = vector.load %arg3[%c0_4, %c0_5] : memref<36x16xbf16, #tpu.memory_space<vmem>>, vector<36x16xbf16>
    %cst = arith.constant dense<0.000000e+00> : vector<128x16xf32>
    %6 = tpu.matmul %4, %5, %cst {dimension_numbers = #tpu.dot_dimension_numbers<[1], [0], [0], [1], [0, 0, 1, 1], [], []>} : vector<128x36xbf16>, vector<36x16xbf16>, vector<128x16xf32> -> vector<128x16xf32>
    %7 = arith.addf %3, %6 : vector<128x16xf32>
    %c0_6 = arith.constant 0 : index
    %c0_7 = arith.constant 0 : index
    %8 = vector.load %arg6[%c0_6, %c0_7] : memref<128x16xf32, #tpu.memory_space<vmem>>, vector<128x16xf32>
    tpu.vector_store %arg6[%c0_6, %c0_7], %7 {strides = array<i32>} : memref<128x16xf32, #tpu.memory_space<vmem>>, vector<128x16xf32>,
    %c0_i32_8 = arith.constant 0 : i32
    %9 = arith.cmpi eq, %arg1, %c0_i32_8 : i32
    %10 = arith.extui %9 : i1 to i32
    %c0_i32_9 = arith.constant 0 : i32
    %11 = arith.cmpi ne, %10, %c0_i32_9 : i32
    scf.if %11 {
      %c0_10 = arith.constant 0 : index
      %c0_11 = arith.constant 0 : index
      %12 = vector.load %arg6[%c0_10, %c0_11] : memref<128x16xf32, #tpu.memory_space<vmem>>, vector<128x16xf32>
      %c0_12 = arith.constant 0 : index
      %c0_13 = arith.constant 0 : index
      %13 = vector.load %arg4[%c0_12, %c0_13] : memref<1x16xf32, #tpu.memory_space<vmem>>, vector<1x16xf32>
      %14 = vector.broadcast %13 : vector<1x16xf32> to vector<128x16xf32>
      %15 = arith.addf %12, %14 : vector<128x16xf32>
      %cst_14 = arith.constant 0.000000e+00 : f32
      %16 = vector.broadcast %cst_14 : f32 to vector<128x16xf32>
      %17 = arith.maximumf %15, %16 : vector<128x16xf32>
      %18 = arith.truncf %17 : vector<128x16xf32> to vector<128x16xbf16>
      %c0_15 = arith.constant 0 : index
      %c0_16 = arith.constant 0 : index
      %19 = vector.load %arg5[%c0_15, %c0_16] : memref<128x16xbf16, #tpu.memory_space<vmem>>, vector<128x16xbf16>
      tpu.vector_store %arg5[%c0_15, %c0_16], %18 {strides = array<i32>} : memref<128x16xbf16, #tpu.memory_space<vmem>>, vector<128x16xbf16>,
    } else {
    }
    return
  }
  func.func @transform_0(%arg0: i32, %arg1: i32) -> (i32, i32) {
    %c0_i32 = arith.constant 0 : i32
    return %arg0, %arg1 : i32, i32
  }
  func.func @transform_1(%arg0: i32, %arg1: i32) -> (i32, i32) {
    %c0_i32 = arith.constant 0 : i32
    %c0_i32_0 = arith.constant 0 : i32
    return %arg1, %c0_i32 : i32, i32
  }
  func.func @transform_2(%arg0: i32, %arg1: i32) -> (i32, i32) {
    %c0_i32 = arith.constant 0 : i32
    %c0_i32_0 = arith.constant 0 : i32
    %c0_i32_1 = arith.constant 0 : i32
    return %c0_i32, %c0_i32_0 : i32, i32
  }
  func.func @transform_3(%arg0: i32, %arg1: i32) -> (i32, i32) {
    %c0_i32 = arith.constant 0 : i32
    %c0_i32_0 = arith.constant 0 : i32
    return %arg0, %c0_i32 : i32, i32
  }
}

module attributes {stable_mosaic.version = 11 : i64} {
  func.func @_conv_scut_bn_kernel(%arg0: i32, %arg1: i32, %arg2: memref<128x144xbf16, #tpu.memory_space<vmem>>, %arg3: memref<144x16xbf16, #tpu.memory_space<vmem>>, %arg4: memref<128x4xbf16, #tpu.memory_space<vmem>>, %arg5: memref<4x16xbf16, #tpu.memory_space<vmem>>, %arg6: memref<1x16xf32, #tpu.memory_space<vmem>>, %arg7: memref<1x16xf32, #tpu.memory_space<vmem>>, %arg8: memref<1x16xf32, #tpu.memory_space<vmem>>, %arg9: memref<128x16xf32, #tpu.memory_space<vmem>>, %arg10: memref<128x16xf32, #tpu.memory_space<vmem>>) attributes {dimension_semantics = [#tpu.dimension_semantics<parallel>, #tpu.dimension_semantics<arbitrary>], iteration_bounds = array<i64: 1, 1>, scalar_prefetch = 0 : i64, scratch_operands = 1 : i64, tpu.core_type = #tpu.core_type<tc>, window_params = [{transform_indices = @transform_0, window_bounds = array<i64: 128, 144>}, {transform_indices = @transform_1, window_bounds = array<i64: 144, 16>}, {transform_indices = @transform_2, window_bounds = array<i64: 128, 4>}, {pipeline_mode = #tpu.pipeline_mode<synchronous>, transform_indices = @transform_3, window_bounds = array<i64: 4, 16>}, {pipeline_mode = #tpu.pipeline_mode<synchronous>, transform_indices = @transform_4, window_bounds = array<i64: 1, 16>}, {pipeline_mode = #tpu.pipeline_mode<synchronous>, transform_indices = @transform_5, window_bounds = array<i64: 1, 16>}, {pipeline_mode = #tpu.pipeline_mode<synchronous>, transform_indices = @transform_6, window_bounds = array<i64: 1, 16>}, {transform_indices = @transform_7, window_bounds = array<i64: 128, 16>}]} {
    %c0_i32 = arith.constant 0 : i32
    %0 = arith.cmpi eq, %arg1, %c0_i32 : i32
    %1 = arith.extui %0 : i1 to i32
    %c0_i32_0 = arith.constant 0 : i32
    %2 = arith.cmpi ne, %1, %c0_i32_0 : i32
    scf.if %2 {
      %c0_10 = arith.constant 0 : index
      %c0_11 = arith.constant 0 : index
      %12 = vector.load %arg4[%c0_10, %c0_11] : memref<128x4xbf16, #tpu.memory_space<vmem>>, vector<128x4xbf16>
      %c0_12 = arith.constant 0 : index
      %c0_13 = arith.constant 0 : index
      %13 = vector.load %arg5[%c0_12, %c0_13] : memref<4x16xbf16, #tpu.memory_space<vmem>>, vector<4x16xbf16>
      %cst_14 = arith.constant dense<0.000000e+00> : vector<128x16xf32>
      %14 = tpu.matmul %12, %13, %cst_14 {dimension_numbers = #tpu.dot_dimension_numbers<[1], [0], [0], [1], [0, 0, 1, 1], [], []>} : vector<128x4xbf16>, vector<4x16xbf16>, vector<128x16xf32> -> vector<128x16xf32>
      %c0_15 = arith.constant 0 : index
      %c0_16 = arith.constant 0 : index
      %15 = vector.load %arg6[%c0_15, %c0_16] : memref<1x16xf32, #tpu.memory_space<vmem>>, vector<1x16xf32>
      %16 = vector.broadcast %15 : vector<1x16xf32> to vector<128x16xf32>
      %17 = arith.addf %14, %16 : vector<128x16xf32>
      %c0_17 = arith.constant 0 : index
      %c0_18 = arith.constant 0 : index
      %18 = vector.load %arg10[%c0_17, %c0_18] : memref<128x16xf32, #tpu.memory_space<vmem>>, vector<128x16xf32>
      tpu.vector_store %arg10[%c0_17, %c0_18], %17 {strides = array<i32>} : memref<128x16xf32, #tpu.memory_space<vmem>>, vector<128x16xf32>,
    } else {
    }
    %c0 = arith.constant 0 : index
    %c0_1 = arith.constant 0 : index
    %3 = vector.load %arg10[%c0, %c0_1] : memref<128x16xf32, #tpu.memory_space<vmem>>, vector<128x16xf32>
    %c0_2 = arith.constant 0 : index
    %c0_3 = arith.constant 0 : index
    %4 = vector.load %arg2[%c0_2, %c0_3] : memref<128x144xbf16, #tpu.memory_space<vmem>>, vector<128x144xbf16>
    %c0_4 = arith.constant 0 : index
    %c0_5 = arith.constant 0 : index
    %5 = vector.load %arg3[%c0_4, %c0_5] : memref<144x16xbf16, #tpu.memory_space<vmem>>, vector<144x16xbf16>
    %cst = arith.constant dense<0.000000e+00> : vector<128x16xf32>
    %6 = tpu.matmul %4, %5, %cst {dimension_numbers = #tpu.dot_dimension_numbers<[1], [0], [0], [1], [0, 0, 1, 1], [], []>} : vector<128x144xbf16>, vector<144x16xbf16>, vector<128x16xf32> -> vector<128x16xf32>
    %7 = arith.addf %3, %6 : vector<128x16xf32>
    %c0_6 = arith.constant 0 : index
    %c0_7 = arith.constant 0 : index
    %8 = vector.load %arg10[%c0_6, %c0_7] : memref<128x16xf32, #tpu.memory_space<vmem>>, vector<128x16xf32>
    tpu.vector_store %arg10[%c0_6, %c0_7], %7 {strides = array<i32>} : memref<128x16xf32, #tpu.memory_space<vmem>>, vector<128x16xf32>,
    %c0_i32_8 = arith.constant 0 : i32
    %9 = arith.cmpi eq, %arg1, %c0_i32_8 : i32
    %10 = arith.extui %9 : i1 to i32
    %c0_i32_9 = arith.constant 0 : i32
    %11 = arith.cmpi ne, %10, %c0_i32_9 : i32
    scf.if %11 {
      %c0_10 = arith.constant 0 : index
      %c0_11 = arith.constant 0 : index
      %12 = vector.load %arg10[%c0_10, %c0_11] : memref<128x16xf32, #tpu.memory_space<vmem>>, vector<128x16xf32>
      %c0_12 = arith.constant 0 : index
      %c0_13 = arith.constant 0 : index
      %13 = vector.load %arg7[%c0_12, %c0_13] : memref<1x16xf32, #tpu.memory_space<vmem>>, vector<1x16xf32>
      %14 = vector.broadcast %13 : vector<1x16xf32> to vector<128x16xf32>
      %15 = arith.mulf %12, %14 : vector<128x16xf32>
      %c0_14 = arith.constant 0 : index
      %c0_15 = arith.constant 0 : index
      %16 = vector.load %arg8[%c0_14, %c0_15] : memref<1x16xf32, #tpu.memory_space<vmem>>, vector<1x16xf32>
      %17 = vector.broadcast %16 : vector<1x16xf32> to vector<128x16xf32>
      %18 = arith.addf %15, %17 : vector<128x16xf32>
      %c0_16 = arith.constant 0 : index
      %c0_17 = arith.constant 0 : index
      %19 = vector.load %arg9[%c0_16, %c0_17] : memref<128x16xf32, #tpu.memory_space<vmem>>, vector<128x16xf32>
      tpu.vector_store %arg9[%c0_16, %c0_17], %18 {strides = array<i32>} : memref<128x16xf32, #tpu.memory_space<vmem>>, vector<128x16xf32>,
    } else {
    }
    return
  }
  func.func @transform_0(%arg0: i32, %arg1: i32) -> (i32, i32) {
    %c0_i32 = arith.constant 0 : i32
    return %arg0, %arg1 : i32, i32
  }
  func.func @transform_1(%arg0: i32, %arg1: i32) -> (i32, i32) {
    %c0_i32 = arith.constant 0 : i32
    %c0_i32_0 = arith.constant 0 : i32
    return %arg1, %c0_i32 : i32, i32
  }
  func.func @transform_2(%arg0: i32, %arg1: i32) -> (i32, i32) {
    %c0_i32 = arith.constant 0 : i32
    %c0_i32_0 = arith.constant 0 : i32
    return %arg0, %c0_i32 : i32, i32
  }
  func.func @transform_3(%arg0: i32, %arg1: i32) -> (i32, i32) {
    %c0_i32 = arith.constant 0 : i32
    %c0_i32_0 = arith.constant 0 : i32
    %c0_i32_1 = arith.constant 0 : i32
    return %c0_i32, %c0_i32_0 : i32, i32
  }
  func.func @transform_4(%arg0: i32, %arg1: i32) -> (i32, i32) {
    %c0_i32 = arith.constant 0 : i32
    %c0_i32_0 = arith.constant 0 : i32
    %c0_i32_1 = arith.constant 0 : i32
    return %c0_i32, %c0_i32_0 : i32, i32
  }
  func.func @transform_5(%arg0: i32, %arg1: i32) -> (i32, i32) {
    %c0_i32 = arith.constant 0 : i32
    %c0_i32_0 = arith.constant 0 : i32
    %c0_i32_1 = arith.constant 0 : i32
    return %c0_i32, %c0_i32_0 : i32, i32
  }
  func.func @transform_6(%arg0: i32, %arg1: i32) -> (i32, i32) {
    %c0_i32 = arith.constant 0 : i32
    %c0_i32_0 = arith.constant 0 : i32
    %c0_i32_1 = arith.constant 0 : i32
    return %c0_i32, %c0_i32_0 : i32, i32
  }
  func.func @transform_7(%arg0: i32, %arg1: i32) -> (i32, i32) {
    %c0_i32 = arith.constant 0 : i32
    %c0_i32_0 = arith.constant 0 : i32
    return %arg0, %c0_i32 : i32, i32
  }
}

</mosaic_0001>

<bundles_post_ra>
// kernel: basicblock_forward.2
= control target key start
LH: loop header
LB: loop body
LE: loop exit
PB: predicated region body
PF: predicated region fallthrough
CT: control target
= control target key end

     0   :  { %vm153_vm0 = vcmask 1041408   ;;  %vm128_vm1 = vcmask 293888   ;;  %vm19_vm2 = vcmask 130048   ;;  %v535_v2 = vmov 0.0   ;;  %s717_s1 = inlined_call_operand.vmem [shape: bf16[36,16], index: 1, kind: input, shape index: {}]   ;;  %s718_s0 = inlined_call_operand.vmem [shape: bf16[128,36], index: 0, kind: input, shape index: {}]   ;;  %s719_s2 = inlined_call_operand.vmem [shape: f32[1,16], index: 2, kind: input, shape index: {}]   ;;  %s720_s3 = inlined_call_operand.vmem [shape: bf16[128,16], index: 3, kind: output, shape index: {}]  }
   0x1   :  { %v524_v0 = vld [vmem:[%s717_s1 + $0x10] ss:$0 sps:$4 sm:$0x33]   ;;  %v525_v1 = vld [vmem:[%s717_s1 + $0x8] sm:$0xff]   ;;  %22 = vst.msk [vmem:[#allocation2 + $0x10] sm:$0xff] %vm19_vm2, %v535_v2  ;;  %20 = vst.msk [vmem:[#allocation2] sm:$0xff] %vm19_vm2, %v535_v2 }
   0x2   :  { %21 = vst.msk [vmem:[#allocation2 + $0x8] sm:$0xff] %vm19_vm2, %v535_v2  ;;  %23 = vst.msk [vmem:[#allocation2 + $0x18] sm:$0xff] %vm19_vm2, %v535_v2  ;;  %521 = vmatprep.subr.msk.bf16.mxu0 %vm153_vm0, %v524_v0  ;;  %522 = vmatprep.subr.msk.bf16.mxu1 %vm153_vm0, %v524_v0  ;;  %v155_v3 = vsel %vm153_vm0, %v524_v0, 0  ;;  %v526_v4 = vld [vmem:[%s717_s1] sm:$0xff]   ;;  %v529_v7 = vld [vmem:[%s718_s0 + $0x8] sm:$0xff]   ;;  %vm409_vm3 = vcmask 125952  }
   0x3   :  { %24 = vst.msk [vmem:[#allocation2 + $0x20] sm:$0xff] %vm19_vm2, %v535_v2  ;;  %25 = vst.msk [vmem:[#allocation2 + $0x28] sm:$0xff] %vm19_vm2, %v535_v2  ;;  %494 = vmatpush3.bf16.msra.mxu0 %v155_v3  ;;  %518 = vmatpush3.bf16.msra.mxu1 %v155_v3  ;;  %v527_v5 = vld [vmem:[%s718_s0] sm:$0xff]   ;;  %v530_v8 = vld [vmem:[%s718_s0 + $0x28] sm:$0xff]  }
   0x4   :  { %26 = vst.msk [vmem:[#allocation2 + $0x30] sm:$0xff] %vm19_vm2, %v535_v2  ;;  %27 = vst.msk [vmem:[#allocation2 + $0x38] sm:$0xff] %vm19_vm2, %v535_v2  ;;  %495 = vmatprep.subr.bf16.mxu0 %v525_v1  ;;  %516 = vmatprep.subr.bf16.mxu1 %v525_v1  ;;  %v528_v6 = vld [vmem:[%s718_s0 + $0x20] sm:$0xff]   ;;  %v531_v9 = vld [vmem:[%s718_s0 + $0x10] sm:$0xff]  }
   0x5   :  { %28 = vst.msk [vmem:[#allocation2 + $0x40] sm:$0xff] %vm19_vm2, %v535_v2  ;;  %29 = vst.msk [vmem:[#allocation2 + $0x48] sm:$0xff] %vm19_vm2, %v535_v2  ;;  %499 = vmatprep.mubr.msk.bf16.mxu0 %vm128_vm1, %v527_v5  ;;  %507 = vmatprep.mubr.msk.bf16.mxu1 %vm128_vm1, %v528_v6  ;;  %v532_v10 = vld [vmem:[%s718_s0 + $0x30] sm:$0xff]   ;;  %v533_v11 = vld [vmem:[%s718_s0 + $0x18] sm:$0xff]  }
   0x6   :  { %30 = vst.msk [vmem:[#allocation2 + $0x50] sm:$0xff] %vm19_vm2, %v535_v2  ;;  %31 = vst.msk [vmem:[#allocation2 + $0x58] sm:$0xff] %vm19_vm2, %v535_v2  ;;  %v534_v12 = vld [vmem:[%s718_s0 + $0x38] sm:$0xff]   ;;  %v625_v39 = vld [vmem:[%s719_s2] ss:$0 sm:$0xff] }
   0x7   :  { %32 = vst.msk [vmem:[#allocation2 + $0x60] sm:$0xff] %vm19_vm2, %v535_v2  ;;  %33 = vst.msk [vmem:[#allocation2 + $0x68] sm:$0xff] %vm19_vm2, %v535_v2  ;;  %496 = vmatpush3.bf16.msra.mxu0 %v525_v1  ;;  %519 = vmatpush3.bf16.msra.mxu1 %v525_v1 }
   0x8   :  { %34 = vst.msk [vmem:[#allocation2 + $0x70] sm:$0xff] %vm19_vm2, %v535_v2  ;;  %35 = vst.msk [vmem:[#allocation2 + $0x78] sm:$0xff] %vm19_vm2, %v535_v2  ;;  %497 = vmatprep.subr.bf16.mxu0 %v526_v4  ;;  %517 = vmatprep.subr.bf16.mxu1 %v526_v4  ;;  %v38_v13 = vld [vmem:[#allocation2 + $0x10] sm:$0xff]  ;;  %v36_v17 = vld [vmem:[#allocation2] sm:$0xff] }
   0x9   :  { %v39_v23 = vld [vmem:[#allocation2 + $0x18] sm:$0xff]  ;;  %v37_v29 = vld [vmem:[#allocation2 + $0x8] sm:$0xff] }
   0xa   :  { %v40_v42 = vld [vmem:[#allocation2 + $0x20] sm:$0xff]  ;;  %v41_v0 = vld [vmem:[#allocation2 + $0x28] sm:$0xff] }
   0xb   :  { %498 = vmatpush3.bf16.msra.mxu0 %v526_v4  ;;  %520 = vmatpush3.bf16.msra.mxu1 %v526_v4  ;;  %v42_v35 = vld [vmem:[#allocation2 + $0x30] sm:$0xff]  ;;  %v43_v54 = vld [vmem:[#allocation2 + $0x38] sm:$0xff] }
   0xc   :  { %v44_v18 = vld [vmem:[#allocation2 + $0x40] sm:$0xff]  ;;  %v45_v30 = vld [vmem:[#allocation2 + $0x48] sm:$0xff] }
   0xd   :  { %v46_v14 = vld [vmem:[#allocation2 + $0x50] sm:$0xff]  ;;  %v47_v24 = vld [vmem:[#allocation2 + $0x58] sm:$0xff] }
   0xe   :  { %500 = vmatmul.mubr.msk.bf16.vlgmr.msra.gmra.mxu0 %vm128_vm1, %v529_v7  ;;  %508 = vmatmul.mubr.msk.bf16.vlgmr.msra.gmra.mxu1 %vm128_vm1, %v530_v8  ;;  %v48_v43 = vld [vmem:[#allocation2 + $0x60] sm:$0xff]  ;;  %v49_v1 = vld [vmem:[#allocation2 + $0x68] sm:$0xff] }
   0xf   :  { %503 = vmatprep.mubr.msk.bf16.mxu0 %vm128_vm1, %v531_v9  ;;  %511 = vmatprep.mubr.msk.bf16.mxu1 %vm128_vm1, %v532_v10  ;;  %v50_v36 = vld [vmem:[#allocation2 + $0x70] sm:$0xff]  ;;  %v51_v55 = vld [vmem:[#allocation2 + $0x78] sm:$0xff] }
  0x16   :  { %504 = vmatmul.mubr.msk.bf16.gmra.mxu0 %vm128_vm1, %v533_v11  ;;  %512 = vmatmul.mubr.msk.bf16.gmra.mxu1 %vm128_vm1, %v534_v12 }
  0xce   :  { %v501_v15 = vpop.f32.mrf.mxu0  ;;  %v509_v16 = vpop.f32.mrf.mxu1 }
  0xcf   :  { %v256_v19 = vadd.f32 %v501_v15, %v38_v13  ;;  %v264_v20 = vadd.f32 %v509_v16, %v46_v14 }
  0xd0   :  { %v191_v21 = vpop.f32.mrf.mxu0  ;;  %v223_v22 = vpop.f32.mrf.mxu1 }
  0xd1   :  { %273 = vst.msk [vmem:[#allocation2 + $0x10] sm:$0xff] %vm19_vm2, %v256_v19  ;;  %281 = vst.msk [vmem:[#allocation2 + $0x50] sm:$0xff] %vm19_vm2, %v264_v20  ;;  %v254_v25 = vadd.f32 %v191_v21, %v36_v17  ;;  %v262_v26 = vadd.f32 %v223_v22, %v44_v18 }
  0xd2   :  { %v502_v27 = vpop.f32.mrf.mxu0  ;;  %v510_v28 = vpop.f32.mrf.mxu1 }
  0xd3   :  { %271 = vst.msk [vmem:[#allocation2] sm:$0xff] %vm19_vm2, %v254_v25  ;;  %279 = vst.msk [vmem:[#allocation2 + $0x40] sm:$0xff] %vm19_vm2, %v262_v26  ;;  %v257_v31 = vadd.f32 %v502_v27, %v39_v23  ;;  %v265_v32 = vadd.f32 %v510_v28, %v47_v24 }
  0xd4   :  { %v194_v33 = vpop.f32.mrf.mxu0  ;;  %v226_v34 = vpop.f32.mrf.mxu1 }
  0xd5   :  { %274 = vst.msk [vmem:[#allocation2 + $0x18] sm:$0xff] %vm19_vm2, %v257_v31  ;;  %282 = vst.msk [vmem:[#allocation2 + $0x58] sm:$0xff] %vm19_vm2, %v265_v32  ;;  %v255_v37 = vadd.f32 %v194_v33, %v37_v29  ;;  %v263_v38 = vadd.f32 %v226_v34, %v45_v30 }
  0xd6   :  { %v505_v40 = vpop.f32.mrf.mxu0  ;;  %v513_v41 = vpop.f32.mrf.mxu1 }
  0xd7   :  { %272 = vst.msk [vmem:[#allocation2 + $0x8] sm:$0xff] %vm19_vm2, %v255_v37  ;;  %280 = vst.msk [vmem:[#allocation2 + $0x48] sm:$0xff] %vm19_vm2, %v263_v38  ;;  %v260_v44 = vadd.f32 %v505_v40, %v42_v35  ;;  %v268_v45 = vadd.f32 %v513_v41, %v50_v36 }
  0xd8   :  { %v292_v46 = vld [vmem:[#allocation2 + $0x10] sm:$0xff]  ;;  %v207_v48 = vpop.f32.mrf.mxu0  ;;  %v239_v49 = vpop.f32.mrf.mxu1 }
  0xd9   :  { %v300_v47 = vld [vmem:[#allocation2 + $0x50] sm:$0xff]  ;;  %v315_v50 = vadd.f32 %v625_v39, %v292_v46  ;;  %277 = vst.msk [vmem:[#allocation2 + $0x30] sm:$0xff] %vm19_vm2, %v260_v44  ;;  %285 = vst.msk [vmem:[#allocation2 + $0x70] sm:$0xff] %vm19_vm2, %v268_v45  ;;  %v258_v52 = vadd.f32 %v207_v48, %v40_v42  ;;  %v266_v53 = vadd.f32 %v239_v49, %v48_v43 }
  0xda   :  { %v323_v51 = vadd.f32 %v625_v39, %v300_v47  ;;  %v290_v56 = vld [vmem:[#allocation2] sm:$0xff]  ;;  %v506_v58 = vpop.f32.mrf.mxu0  ;;  %v514_v59 = vpop.f32.mrf.mxu1 }
  0xdb   :  { %v298_v57 = vld [vmem:[#allocation2 + $0x40] sm:$0xff]  ;;  %v331_v60 = vmax.f32 %v315_v50, 0.0  ;;  %v313_v62 = vadd.f32 %v625_v39, %v290_v56  ;;  %275 = vst.msk [vmem:[#allocation2 + $0x20] sm:$0xff] %vm19_vm2, %v258_v52  ;;  %283 = vst.msk [vmem:[#allocation2 + $0x60] sm:$0xff] %vm19_vm2, %v266_v53  ;;  %v261_v4 = vadd.f32 %v506_v58, %v43_v54  ;;  %v269_v5 = vadd.f32 %v514_v59, %v51_v55 }
  0xdc   :  { %v339_v61 = vmax.f32 %v323_v51, 0.0  ;;  %v321_v63 = vadd.f32 %v625_v39, %v298_v57  ;;  %v293_v2 = vld [vmem:[#allocation2 + $0x18] sm:$0xff]  ;;  %v210_v6 = vpop.f32.mrf.mxu0  ;;  %v242_v7 = vpop.f32.mrf.mxu1 }
  0xdd   :  { %v301_v3 = vld [vmem:[#allocation2 + $0x58] sm:$0xff]  ;;  %v468_v8 = vpack.c.bf16 %v331_v60, %v331_v60  ;;  %v329_v10 = vmax.f32 %v313_v62, 0.0  ;;  %v316_v12 = vadd.f32 %v625_v39, %v293_v2  ;;  %278 = vst.msk [vmem:[#allocation2 + $0x38] sm:$0xff] %vm19_vm2, %v261_v4  ;;  %286 = vst.msk [vmem:[#allocation2 + $0x78] sm:$0xff] %vm19_vm2, %v269_v5  ;;  %v259_v16 = vadd.f32 %v210_v6, %v41_v0 }
  0xde   :  { %v476_v9 = vpack.c.bf16 %v339_v61, %v339_v61  ;;  %v337_v11 = vmax.f32 %v321_v63, 0.0  ;;  %v324_v13 = vadd.f32 %v625_v39, %v301_v3  ;;  %v291_v14 = vld [vmem:[#allocation2 + $0x8] sm:$0xff]  ;;  %v267_v17 = vadd.f32 %v242_v7, %v49_v1 }
  0xdf   :  { %v299_v15 = vld [vmem:[#allocation2 + $0x48] sm:$0xff]  ;;  %412 = vst.msk [vmem:[%s720_s3 + $0x8] sm:$0xf] %vm409_vm3, %v468_v8  ;;  %v466_v18 = vpack.c.bf16 %v329_v10, %v329_v10  ;;  %v314_v20 = vadd.f32 %v625_v39, %v291_v14  ;;  %v332_v22 = vmax.f32 %v316_v12, 0.0 }
  0xe0   :  { %420 = vst.msk [vmem:[%s720_s3 + $0x28] sm:$0xf] %vm409_vm3, %v476_v9  ;;  %v474_v19 = vpack.c.bf16 %v337_v11, %v337_v11  ;;  %v322_v21 = vadd.f32 %v625_v39, %v299_v15  ;;  %v340_v23 = vmax.f32 %v324_v13, 0.0  ;;  %v296_v24 = vld [vmem:[#allocation2 + $0x30] sm:$0xff] }
  0xe1   :  { %v304_v25 = vld [vmem:[#allocation2 + $0x70] sm:$0xff]  ;;  %276 = vst.msk [vmem:[#allocation2 + $0x28] sm:$0xff] %vm19_vm2, %v259_v16  ;;  %284 = vst.msk [vmem:[#allocation2 + $0x68] sm:$0xff] %vm19_vm2, %v267_v17  ;;  %v330_v26 = vmax.f32 %v314_v20, 0.0  ;;  %v319_v28 = vadd.f32 %v625_v39, %v296_v24  ;;  %v469_v30 = vpack.c.bf16 %v332_v22, %v332_v22 }
  0xe2   :  { %410 = vst.msk [vmem:[%s720_s3] sm:$0xf] %vm409_vm3, %v466_v18  ;;  %418 = vst.msk [vmem:[%s720_s3 + $0x20] sm:$0xf] %vm409_vm3, %v474_v19  ;;  %v338_v27 = vmax.f32 %v322_v21, 0.0  ;;  %v327_v29 = vadd.f32 %v625_v39, %v304_v25  ;;  %v477_v31 = vpack.c.bf16 %v340_v23, %v340_v23  ;;  %v294_v32 = vld [vmem:[#allocation2 + $0x20] sm:$0xff] }
  0xe3   :  { %v302_v33 = vld [vmem:[#allocation2 + $0x60] sm:$0xff]  ;;  %v467_v34 = vpack.c.bf16 %v330_v26, %v330_v26  ;;  %v335_v36 = vmax.f32 %v319_v28, 0.0  ;;  %413 = vst.msk [vmem:[%s720_s3 + $0xc] sm:$0xf] %vm409_vm3, %v469_v30  ;;  %v317_v38 = vadd.f32 %v625_v39, %v294_v32 }
  0xe4   :  { %v475_v35 = vpack.c.bf16 %v338_v27, %v338_v27  ;;  %v343_v37 = vmax.f32 %v327_v29, 0.0  ;;  %421 = vst.msk [vmem:[%s720_s3 + $0x2c] sm:$0xf] %vm409_vm3, %v477_v31  ;;  %v325_v40 = vadd.f32 %v625_v39, %v302_v33  ;;  %v297_v43 = vld [vmem:[#allocation2 + $0x38] sm:$0xff] }
  0xe5   :  { %411 = vst.msk [vmem:[%s720_s3 + $0x4] sm:$0xf] %vm409_vm3, %v467_v34  ;;  %v472_v41 = vpack.c.bf16 %v335_v36, %v335_v36  ;;  %v305_v44 = vld [vmem:[#allocation2 + $0x78] sm:$0xff]  ;;  %v333_v45 = vmax.f32 %v317_v38, 0.0  ;;  %v320_v47 = vadd.f32 %v625_v39, %v297_v43 }
  0xe6   :  { %419 = vst.msk [vmem:[%s720_s3 + $0x24] sm:$0xf] %vm409_vm3, %v475_v35  ;;  %v480_v42 = vpack.c.bf16 %v343_v37, %v343_v37  ;;  %v341_v46 = vmax.f32 %v325_v40, 0.0  ;;  %v328_v48 = vadd.f32 %v625_v39, %v305_v44 }
  0xe7   :  { %416 = vst.msk [vmem:[%s720_s3 + $0x18] sm:$0xf] %vm409_vm3, %v472_v41  ;;  %v470_v51 = vpack.c.bf16 %v333_v45, %v333_v45  ;;  %v336_v53 = vmax.f32 %v320_v47, 0.0 }
  0xe8   :  { %424 = vst.msk [vmem:[%s720_s3 + $0x38] sm:$0xf] %vm409_vm3, %v480_v42  ;;  %v295_v49 = vld [vmem:[#allocation2 + $0x28] sm:$0xff]  ;;  %v478_v52 = vpack.c.bf16 %v341_v46, %v341_v46  ;;  %v344_v54 = vmax.f32 %v328_v48, 0.0 }
  0xe9   :  { %v303_v50 = vld [vmem:[#allocation2 + $0x68] sm:$0xff]  ;;  %v318_v55 = vadd.f32 %v625_v39, %v295_v49  ;;  %414 = vst.msk [vmem:[%s720_s3 + $0x10] sm:$0xf] %vm409_vm3, %v470_v51  ;;  %v473_v57 = vpack.c.bf16 %v336_v53, %v336_v53 }
  0xea   :  { %v326_v56 = vadd.f32 %v625_v39, %v303_v50  ;;  %422 = vst.msk [vmem:[%s720_s3 + $0x30] sm:$0xf] %vm409_vm3, %v478_v52  ;;  %v481_v58 = vpack.c.bf16 %v344_v54, %v344_v54 }
  0xeb   :  { %v334_v59 = vmax.f32 %v318_v55, 0.0  ;;  %417 = vst.msk [vmem:[%s720_s3 + $0x1c] sm:$0xf] %vm409_vm3, %v473_v57 }
  0xec   :  { %v342_v60 = vmax.f32 %v326_v56, 0.0  ;;  %425 = vst.msk [vmem:[%s720_s3 + $0x3c] sm:$0xf] %vm409_vm3, %v481_v58 }
  0xed   :  { %v471_v39 = vpack.c.bf16 %v334_v59, %v334_v59 }
  0xee   :  { %v479_v61 = vpack.c.bf16 %v342_v60, %v342_v60 }
  0xef   :  { %415 = vst.msk [vmem:[%s720_s3 + $0x14] sm:$0xf] %vm409_vm3, %v471_v39 }
  0xf0   :  { %423 = vst.msk [vmem:[%s720_s3 + $0x34] sm:$0xf] %vm409_vm3, %v479_v61 }

// kernel: basicblock_forward.3
= control target key start
LH: loop header
LB: loop body
LE: loop exit
PB: predicated region body
PF: predicated region fallthrough
CT: control target
= control target key end

     0   :  { %vm121_vm0 = vcmask 1041408   ;;  %v831_v2 = vmov 0   ;;  %vm96_vm1 = vcmask 31744   ;;  %vm222_vm2 = vcmask 130048   ;;  %s1107_s0 = inlined_call_operand.vmem [shape: bf16[128,144], index: 0, kind: input, shape index: {}]   ;;  %s1108_s1 = inlined_call_operand.vmem [shape: bf16[144,16], index: 1, kind: input, shape index: {}]   ;;  %s1109_s2 = inlined_call_operand.vmem [shape: bf16[128,4], index: 2, kind: input, shape index: {}]   ;;  %s1110_s3 = inlined_call_operand.vmem [shape: bf16[4,16], index: 3, kind: input, shape index: {}]   ;;  %s1111_s4 = inlined_call_operand.vmem [shape: f32[1,16], index: 4, kind: input, shape index: {}]   ;;  %s1112_s5 = inlined_call_operand.vmem [shape: f32[1,16], index: 5, kind: input, shape index: {}]   ;;  %s1113_s6 = inlined_call_operand.vmem [shape: f32[1,16], index: 6, kind: input, shape index: {}]   ;;  %s1114_s7 = inlined_call_operand.hbm [shape: f32[128,16], index: 7, kind: output, shape index: {}]  }
   0x1   :  { %v48_v0 = vld [vmem:[%s1110_s3] sm:$0x3]  ;;  %745 = vmatprep.subr.bf16.mxu1 %v831_v2  ;;  %v768_v3 = vld [vmem:[%s1108_s1 + $0x38] sm:$0xff]   ;;  %v770_v5 = vld [vmem:[%s1109_s2 + $0x8] sm:$0xff]  }
   0x2   :  { %763 = vmatprep.subr.msk.bf16.mxu0 %vm121_vm0, %v48_v0  ;;  %v123_v1 = vsel %vm121_vm0, %v48_v0, 0  ;;  %v769_v4 = vld [vmem:[%s1109_s2] sm:$0xff]   ;;  %754 = vmatpush1.bf16.msra.mxu1 %v768_v3  ;;  %v771_v6 = vld [vmem:[%s1108_s1 + $0x30] sm:$0xff]   ;;  %v772_v7 = vld [vmem:[%s1108_s1 + $0x28] sm:$0xff]  }
   0x3   :  { %728 = vmatpush3.bf16.msra.mxu0 %v123_v1  ;;  %729 = vmatprep.mubr.msk.bf16.mxu0 %vm96_vm1, %v769_v4  ;;  %v774_v8 = vld [vmem:[%s1109_s2 + $0x10] sm:$0xff]   ;;  %v775_v9 = vld [vmem:[%s1109_s2 + $0x18] sm:$0xff]   ;;  %v773_v10 = vld [vmem:[%s1108_s1 + $0x20] sm:$0xff]  }
   0x4   :  { %440 = vmatprep.subr.bf16.mxu0 %v831_v2  ;;  %746 = vmatprep.subr.bf16.mxu1 %v831_v2  ;;  %v778_v11 = vld [vmem:[%s1109_s2 + $0x20] sm:$0xff]   ;;  %v776_v12 = vld [vmem:[%s1108_s1 + $0x18] sm:$0xff]   ;;  %v779_v13 = vld [vmem:[%s1109_s2 + $0x28] sm:$0xff]  }
   0x5   :  { %v782_v14 = vld [vmem:[%s1109_s2 + $0x30] sm:$0xff]   ;;  %v780_v17 = vld [vmem:[%s1108_s1 + $0x8] sm:$0xff]   ;;  %v783_v18 = vld [vmem:[%s1109_s2 + $0x38] sm:$0xff]  }
   0x6   :  { %730 = vmatmul.mubr.msk.bf16.vlgmr.msra.gmra.mxu0 %vm96_vm1, %v770_v5  ;;  %755 = vmatpush1.bf16.msra.mxu1 %v771_v6  ;;  %v787_v15 = vld [vmem:[%s1107_s0 + $0x34] ss:$8 sps:$4 sm:$0xff]   ;;  %v790_v19 = vld [vmem:[%s1107_s0 + $0x4] ss:$8 sps:$4 sm:$0xff]  }
   0x7   :  { %441 = vmatpush1.bf16.msra.mxu0 %v768_v3  ;;  %747 = vmatprep.subr.bf16.mxu1 %v831_v2  ;;  %v777_v16 = vld [vmem:[%s1108_s1 + $0x10] sm:$0xff]   ;;  %v781_v20 = vld [vmem:[%s1108_s1] sm:$0xff]  }
   0x8   :  { %442 = vmatprep.subr.bf16.mxu0 %v831_v2  ;;  %733 = vmatprep.mubr.msk.bf16.mxu0 %vm96_vm1, %v774_v8 }
   0x9   :  { %711 = vmatprep.mubr.msk.bf16.mxu1 %vm222_vm2, %v787_v15 }
   0xa   :  { %756 = vmatpush1.bf16.msra.mxu1 %v772_v7 }
   0xb   :  { %443 = vmatpush1.bf16.msra.mxu0 %v771_v6  ;;  %748 = vmatprep.subr.bf16.mxu1 %v831_v2 }
   0xc   :  { %444 = vmatprep.subr.bf16.mxu0 %v831_v2 }
   0xe   :  { %734 = vmatmul.mubr.msk.bf16.gmra.mxu0 %vm96_vm1, %v775_v9  ;;  %757 = vmatpush1.bf16.msra.mxu1 %v773_v10 }
   0xf   :  { %445 = vmatpush1.bf16.msra.mxu0 %v772_v7  ;;  %737 = vmatprep.mubr.msk.bf16.mxu0 %vm96_vm1, %v778_v11 }
  0x10   :  { %446 = vmatprep.subr.bf16.mxu0 %v831_v2  ;;  %749 = vmatprep.subr.bf16.mxu1 %v831_v2 }
  0x12   :  { %758 = vmatpush1.bf16.msra.mxu1 %v776_v12 }
  0x13   :  { %447 = vmatpush1.bf16.msra.mxu0 %v773_v10  ;;  %750 = vmatprep.subr.bf16.mxu1 %v831_v2 }
  0x14   :  { %448 = vmatprep.subr.bf16.mxu0 %v831_v2 }
  0x16   :  { %738 = vmatmul.mubr.msk.bf16.gmra.mxu0 %vm96_vm1, %v779_v13  ;;  %759 = vmatpush1.bf16.msra.mxu1 %v777_v16 }
  0x17   :  { %449 = vmatpush1.bf16.msra.mxu0 %v776_v12  ;;  %741 = vmatprep.mubr.msk.bf16.mxu0 %vm96_vm1, %v782_v14 }
  0x18   :  { %450 = vmatprep.subr.bf16.mxu0 %v831_v2  ;;  %751 = vmatprep.subr.bf16.mxu1 %v831_v2 }
  0x1a   :  { %760 = vmatpush1.bf16.msra.mxu1 %v780_v17 }
  0x1b   :  { %451 = vmatpush1.bf16.msra.mxu0 %v777_v16  ;;  %752 = vmatprep.subr.bf16.mxu1 %v831_v2 }
  0x1c   :  { %452 = vmatprep.subr.bf16.mxu0 %v831_v2 }
  0x1d   :  { %12 = vsyncpa [#allocation4], 0  ;;  %v784_v21 = vld [vmem:[%s1108_s1 + $0x40] sm:$0xff]   ;;  %v785_v22 = vld [vmem:[%s1107_s0 + $0x30] ss:$8 sps:$4 sm:$0xff]  }
  0x1e   :  { %742 = vmatmul.mubr.msk.bf16.gmra.mxu0 %vm96_vm1, %v783_v18  ;;  %761 = vmatpush1.bf16.msra.mxu1 %v781_v20  ;;  %v791_v23 = vld [vmem:[%s1107_s0 + $0x44] ss:$8 sps:$4 sm:$0xff]   ;;  %v788_v24 = vld [vmem:[%s1107_s0] ss:$8 sps:$4 sm:$0xff]   ;;  %v794_v25 = vld [vmem:[%s1107_s0 + $0x14] ss:$8 sps:$4 sm:$0xff]  }
  0x1f   :  { %453 = vmatpush1.bf16.msra.mxu0 %v780_v17  ;;  %708 = vmatprep.mubr.msk.bf16.mxu0 %vm222_vm2, %v790_v19  ;;  %v793_v26 = vld [vmem:[%s1107_s0 + $0x40] ss:$8 sps:$4 sm:$0xff]   ;;  %v797_v27 = vld [vmem:[%s1107_s0 + $0x54] ss:$8 sps:$4 sm:$0xff]   ;;  %v796_v28 = vld [vmem:[%s1107_s0 + $0x10] ss:$8 sps:$4 sm:$0xff]  }
  0x20   :  { %454 = vmatprep.subr.bf16.mxu0 %v831_v2  ;;  %753 = vmatprep.subr.bf16.mxu1 %v831_v2  ;;  %v800_v29 = vld [vmem:[%s1107_s0 + $0x24] ss:$8 sps:$4 sm:$0xff]   ;;  %v799_v30 = vld [vmem:[%s1107_s0 + $0x50] ss:$8 sps:$4 sm:$0xff]   ;;  %v802_v32 = vld [vmem:[%s1107_s0 + $0x20] ss:$8 sps:$4 sm:$0xff]  }
  0x21   :  { %v803_v31 = vld [vmem:[%s1107_s0 + $0x64] ss:$8 sps:$4 sm:$0xff]   ;;  %v805_v33 = vld [vmem:[%s1107_s0 + $0x60] ss:$8 sps:$4 sm:$0xff]   ;;  %v806_v34 = vld [vmem:[%s1107_s0 + $0x74] ss:$8 sps:$4 sm:$0xff]  }
  0x22   :  { %762 = vmatpush2.bf16.msra.mxu1 %v784_v21  ;;  %v808_v35 = vld [vmem:[%s1107_s0 + $0x70] ss:$8 sps:$4 sm:$0xff]   ;;  %v666_v36 = vld [vmem:[%s1111_s4] ss:$0 sm:$0xff] }
  0x23   :  { %455 = vmatpush1.bf16.msra.mxu0 %v781_v20  ;;  %v1036_v20 = vld [vmem:[%s1112_s5] ss:$0 sm:$0xff]  ;;  %s832_s5 = smov [#allocation3]  }
  0x24   :  { %470 = vmatprep.subr.bf16.mxu0 %v831_v2 }
  0x25   :  { %497 = vmatmul.mubr.bf16.vlgmr.msra.gmra.mxu1 %v785_v22 }
  0x26   :  { %712 = vmatprep.mubr.msk.bf16.mxu1 %vm222_vm2, %v791_v23 }
  0x27   :  { %471 = vmatpush2.bf16.msra.mxu0 %v784_v21 }
  0x2a   :  { %473 = vmatmul.mubr.bf16.vlgmr.msra.gmra.mxu0 %v788_v24 }
  0x2b   :  { %709 = vmatprep.mubr.msk.bf16.mxu0 %vm222_vm2, %v794_v25 }
  0x2d   :  { %505 = vmatmul.mubr.bf16.gmra.mxu1 %v793_v26  ;;  %v1041_v26 = vld [vmem:[%s1113_s6] ss:$0 sm:$0xff]  ;;  %s655_s6 = sshll.u32 %s832_s5, 4  ;;  %s656_s6 = int_to_ptr.vmem [resolvable:$true] %s655_s6 }
  0x2e   :  { %713 = vmatprep.mubr.msk.bf16.mxu1 %vm222_vm2, %v797_v27  ;;  %s809_s1 = scalar_lea.vmem %s656_s6, 2048  ;;  %p814_p1 = scmp.lt.s32.totalorder %s656_s6, %s656_s6 }
  0x2f   :  { %p810_p0 = scmp.ne.s32.totalorder %s656_s6, %s809_s1  ;;  %p815_p2 = scmp.lt.s32.totalorder %s809_s1, %s809_s1 }
  0x31   :  { %p816_p3 = por %p815_p2, %p814_p1 }
  0x32   :  { %481 = vmatmul.mubr.bf16.gmra.mxu0 %v796_v28 }
  0x33   :  { %710 = vmatprep.mubr.msk.bf16.mxu0 %vm222_vm2, %v800_v29  ;;  %p817_p4 = pnand %p816_p3, %p810_p0 }
  0x35   :  { %513 = vmatmul.mubr.bf16.gmra.mxu1 %v799_v30 }
  0x36   :  { %714 = vmatprep.mubr.msk.bf16.mxu1 %vm222_vm2, %v803_v31 }
  0x3a   :  { %489 = vmatmul.mubr.bf16.gmra.mxu0 %v802_v32 }
  0x3d   :  { %521 = vmatmul.mubr.bf16.gmra.mxu1 %v805_v33 }
  0x3e   :  { %715 = vmatprep.mubr.msk.bf16.mxu1 %vm222_vm2, %v806_v34 }
  0x45   :  { %529 = vmatmul.mubr.bf16.gmra.mxu1 %v808_v35 }
  0xc6   :  { %v731_v37 = vpop.f32.mrf.mxu0 }
  0xc7   :  { %v168_v38 = vadd.f32 %v731_v37, %v666_v36 }
  0xc8   :  { %v159_v39 = vpop.f32.mrf.mxu0 }
  0xc9   :  { %225 = vst.msk [vmem:[#allocation2 + $0x10] sm:$0xff] %vm222_vm2, %v168_v38  ;;  %v160_v40 = vadd.f32 %v666_v36, %v159_v39 }
  0xca   :  { %v732_v41 = vpop.f32.mrf.mxu0 }
  0xcb   :  { %223 = vst.msk [vmem:[#allocation2] sm:$0xff] %vm222_vm2, %v160_v40  ;;  %v171_v42 = vadd.f32 %v732_v41, %v666_v36 }
  0xcc   :  { %v162_v43 = vpop.f32.mrf.mxu0 }
  0xcd   :  { %226 = vst.msk [vmem:[#allocation2 + $0x18] sm:$0xff] %vm222_vm2, %v171_v42  ;;  %v163_v44 = vadd.f32 %v666_v36, %v162_v43 }
  0xce   :  { %v735_v45 = vpop.f32.mrf.mxu0 }
  0xcf   :  { %224 = vst.msk [vmem:[#allocation2 + $0x8] sm:$0xff] %vm222_vm2, %v163_v44  ;;  %v184_v46 = vadd.f32 %v735_v45, %v666_v36 }
  0xd0   :  { %v175_v47 = vpop.f32.mrf.mxu0  ;;  %v241_v29 = vld [vmem:[#allocation2 + $0x10] sm:$0xff] }
  0xd1   :  { %229 = vst.msk [vmem:[#allocation2 + $0x30] sm:$0xff] %vm222_vm2, %v184_v46  ;;  %v176_v48 = vadd.f32 %v666_v36, %v175_v47 }
  0xd2   :  { %v736_v49 = vpop.f32.mrf.mxu0  ;;  %v239_v9 = vld [vmem:[#allocation2] sm:$0xff] }
  0xd3   :  { %227 = vst.msk [vmem:[#allocation2 + $0x20] sm:$0xff] %vm222_vm2, %v176_v48  ;;  %v187_v50 = vadd.f32 %v736_v49, %v666_v36 }
  0xd4   :  { %v178_v51 = vpop.f32.mrf.mxu0  ;;  %v242_v42 = vld [vmem:[#allocation2 + $0x18] sm:$0xff] }
  0xd5   :  { %230 = vst.msk [vmem:[#allocation2 + $0x38] sm:$0xff] %vm222_vm2, %v187_v50  ;;  %v179_v52 = vadd.f32 %v666_v36, %v178_v51 }
  0xd6   :  { %v739_v53 = vpop.f32.mrf.mxu0  ;;  %v240_v18 = vld [vmem:[#allocation2 + $0x8] sm:$0xff] }
  0xd7   :  { %228 = vst.msk [vmem:[#allocation2 + $0x28] sm:$0xff] %vm222_vm2, %v179_v52  ;;  %v200_v54 = vadd.f32 %v739_v53, %v666_v36 }
  0xd8   :  { %v191_v55 = vpop.f32.mrf.mxu0  ;;  %v245_v4 = vld [vmem:[#allocation2 + $0x30] sm:$0xff] }
  0xd9   :  { %233 = vst.msk [vmem:[#allocation2 + $0x50] sm:$0xff] %vm222_vm2, %v200_v54  ;;  %v192_v56 = vadd.f32 %v666_v36, %v191_v55 }
  0xda   :  { %v740_v57 = vpop.f32.mrf.mxu0 }
  0xdb   :  { %231 = vst.msk [vmem:[#allocation2 + $0x40] sm:$0xff] %vm222_vm2, %v192_v56  ;;  %v203_v58 = vadd.f32 %v740_v57, %v666_v36  ;;  %v243_v56 = vld [vmem:[#allocation2 + $0x20] sm:$0xff] }
  0xdc   :  { %v194_v59 = vpop.f32.mrf.mxu0  ;;  %v246_v12 = vld [vmem:[#allocation2 + $0x38] sm:$0xff] }
  0xdd   :  { %234 = vst.msk [vmem:[#allocation2 + $0x58] sm:$0xff] %vm222_vm2, %v203_v58  ;;  %v195_v60 = vadd.f32 %v666_v36, %v194_v59 }
  0xde   :  { %v743_v61 = vpop.f32.mrf.mxu0 }
  0xdf   :  { %232 = vst.msk [vmem:[#allocation2 + $0x48] sm:$0xff] %vm222_vm2, %v195_v60  ;;  %v216_v62 = vadd.f32 %v743_v61, %v666_v36 }
  0xe0   :  { %v207_v63 = vpop.f32.mrf.mxu0  ;;  %v249_v46 = vld [vmem:[#allocation2 + $0x50] sm:$0xff] }
  0xe1   :  { %237 = vst.msk [vmem:[#allocation2 + $0x70] sm:$0xff] %vm222_vm2, %v216_v62  ;;  %v208_v0 = vadd.f32 %v666_v36, %v207_v63 }
  0xe2   :  { %v744_v1 = vpop.f32.mrf.mxu0  ;;  %v247_v17 = vld [vmem:[#allocation2 + $0x40] sm:$0xff] }
  0xe3   :  { %235 = vst.msk [vmem:[#allocation2 + $0x60] sm:$0xff] %vm222_vm2, %v208_v0  ;;  %v219_v2 = vadd.f32 %v744_v1, %v666_v36 }
  0xe4   :  { %v210_v3 = vpop.f32.mrf.mxu0  ;;  %v250_v60 = vld [vmem:[#allocation2 + $0x58] sm:$0xff] }
  0xe5   :  { %238 = vst.msk [vmem:[#allocation2 + $0x78] sm:$0xff] %vm222_vm2, %v219_v2  ;;  %v211_v5 = vadd.f32 %v666_v36, %v210_v3  ;;  %v498_v6 = vpop.f32.mrf.mxu1 }
  0xe6   :  { %v543_v7 = vadd.f32 %v498_v6, %v245_v4  ;;  %v248_v32 = vld [vmem:[#allocation2 + $0x48] sm:$0xff] }
  0xe7   :  { %236 = vst.msk [vmem:[#allocation2 + $0x68] sm:$0xff] %vm222_vm2, %v211_v5  ;;  %v500_v8 = vpop.f32.mrf.mxu1  ;;  %v244_v6 = vld [vmem:[#allocation2 + $0x28] sm:$0xff] }
  0xe8   :  { %559 = vst.msk [vmem:[#allocation2 + $0x30] sm:$0xff] %vm222_vm2, %v543_v7 }
  0xe9   :  { %v501_v13 = vpop.f32.mrf.mxu1 }
  0xea   :  { %v474_v10 = vpop.f32.mrf.mxu0  ;;  %v544_v14 = vadd.f32 %v501_v13, %v246_v12 }
  0xeb   :  { %v537_v11 = vadd.f32 %v474_v10, %v239_v9  ;;  %v503_v16 = vpop.f32.mrf.mxu1  ;;  %v251_v10 = vld [vmem:[#allocation2 + $0x60] sm:$0xff] }
  0xec   :  { %v476_v15 = vpop.f32.mrf.mxu0  ;;  %560 = vst.msk [vmem:[#allocation2 + $0x38] sm:$0xff] %vm222_vm2, %v544_v14 }
  0xed   :  { %553 = vst.msk [vmem:[#allocation2] sm:$0xff] %vm222_vm2, %v537_v11  ;;  %v506_v22 = vpop.f32.mrf.mxu1 }
  0xee   :  { %v477_v19 = vpop.f32.mrf.mxu0  ;;  %v545_v23 = vadd.f32 %v506_v22, %v247_v17  ;;  %v252_v22 = vld [vmem:[#allocation2 + $0x68] sm:$0xff] }
  0xef   :  { %v538_v21 = vadd.f32 %v477_v19, %v240_v18  ;;  %v578_v25 = vld [vmem:[#allocation2 + $0x30] sm:$0xff]  ;;  %v508_v27 = vpop.f32.mrf.mxu1 }
  0xf0   :  { %v479_v24 = vpop.f32.mrf.mxu0  ;;  %v601_v28 = vmul.f32 %v1036_v20, %v578_v25  ;;  %561 = vst.msk [vmem:[#allocation2 + $0x40] sm:$0xff] %vm222_vm2, %v545_v23 }
  0xf1   :  { %554 = vst.msk [vmem:[#allocation2 + $0x8] sm:$0xff] %vm222_vm2, %v538_v21  ;;  %v509_v33 = vpop.f32.mrf.mxu1 }
  0xf2   :  { %v482_v30 = vpop.f32.mrf.mxu0  ;;  %v624_v34 = vadd.f32 %v1041_v26, %v601_v28  ;;  %v546_v36 = vadd.f32 %v509_v33, %v248_v32  ;;  %v253_v33 = vld [vmem:[#allocation2 + $0x70] sm:$0xff] }
  0xf3   :  { %v539_v31 = vadd.f32 %v482_v30, %v241_v29  ;;  %v579_v39 = vld [vmem:[#allocation2 + $0x38] sm:$0xff]  ;;  %v511_v40 = vpop.f32.mrf.mxu1 }
  0xf4   :  { %v572_v35 = vld [vmem:[#allocation2] sm:$0xff]  ;;  %v484_v37 = vpop.f32.mrf.mxu0  ;;  %640 = vst.msk [vmem:[#allocation3 + $0x30] sm:$0xff] %vm222_vm2, %v624_v34  ;;  %v602_v41 = vmul.f32 %v1036_v20, %v579_v39  ;;  %562 = vst.msk [vmem:[#allocation2 + $0x48] sm:$0xff] %vm222_vm2, %v546_v36 }
  0xf5   :  { %v595_v38 = vmul.f32 %v1036_v20, %v572_v35  ;;  %555 = vst.msk [vmem:[#allocation2 + $0x10] sm:$0xff] %vm222_vm2, %v539_v31  ;;  %v514_v47 = vpop.f32.mrf.mxu1 }
  0xf6   :  { %v485_v43 = vpop.f32.mrf.mxu0  ;;  %v625_v48 = vadd.f32 %v1041_v26, %v602_v41  ;;  %v547_v50 = vadd.f32 %v514_v47, %v249_v46 }
  0xf7   :  { %v618_v44 = vadd.f32 %v1041_v26, %v595_v38  ;;  %v540_v45 = vadd.f32 %v485_v43, %v242_v42  ;;  %v580_v53 = vld [vmem:[#allocation2 + $0x40] sm:$0xff]  ;;  %v516_v54 = vpop.f32.mrf.mxu1  ;;  %v254_v43 = vld [vmem:[#allocation2 + $0x78] sm:$0xff] }
  0xf8   :  { %v573_v49 = vld [vmem:[#allocation2 + $0x8] sm:$0xff]  ;;  %v487_v51 = vpop.f32.mrf.mxu0  ;;  %641 = vst.msk [vmem:[#allocation3 + $0x38] sm:$0xff] %vm222_vm2, %v625_v48  ;;  %v603_v55 = vmul.f32 %v1036_v20, %v580_v53  ;;  %563 = vst.msk [vmem:[#allocation2 + $0x50] sm:$0xff] %vm222_vm2, %v547_v50 }
  0xf9   :  { %634 = vst.msk [vmem:[#allocation3] sm:$0xff] %vm222_vm2, %v618_v44  ;;  %v596_v52 = vmul.f32 %v1036_v20, %v573_v49  ;;  %556 = vst.msk [vmem:[#allocation2 + $0x18] sm:$0xff] %vm222_vm2, %v540_v45  ;;  %v517_v61 = vpop.f32.mrf.mxu1 }
  0xfa   :  { %v490_v57 = vpop.f32.mrf.mxu0  ;;  %v626_v62 = vadd.f32 %v1041_v26, %v603_v55  ;;  %v548_v0 = vadd.f32 %v517_v61, %v250_v60 }
  0xfb   :  { %v619_v58 = vadd.f32 %v1041_v26, %v596_v52  ;;  %v541_v59 = vadd.f32 %v490_v57, %v243_v56  ;;  %v581_v3 = vld [vmem:[#allocation2 + $0x48] sm:$0xff]  ;;  %v519_v4 = vpop.f32.mrf.mxu1 }
  0xfc   :  { %v574_v63 = vld [vmem:[#allocation2 + $0x10] sm:$0xff]  ;;  %v492_v1 = vpop.f32.mrf.mxu0  ;;  %642 = vst.msk [vmem:[#allocation3 + $0x40] sm:$0xff] %vm222_vm2, %v626_v62  ;;  %v604_v5 = vmul.f32 %v1036_v20, %v581_v3  ;;  %564 = vst.msk [vmem:[#allocation2 + $0x58] sm:$0xff] %vm222_vm2, %v548_v0 }
  0xfd   :  { %635 = vst.msk [vmem:[#allocation3 + $0x8] sm:$0xff] %vm222_vm2, %v619_v58  ;;  %v597_v2 = vmul.f32 %v1036_v20, %v574_v63  ;;  %557 = vst.msk [vmem:[#allocation2 + $0x20] sm:$0xff] %vm222_vm2, %v541_v59  ;;  %v522_v11 = vpop.f32.mrf.mxu1 }
  0xfe   :  { %v493_v7 = vpop.f32.mrf.mxu0  ;;  %v627_v12 = vadd.f32 %v1041_v26, %v604_v5  ;;  %v549_v14 = vadd.f32 %v522_v11, %v251_v10 }
  0xff   :  { %v620_v8 = vadd.f32 %v1041_v26, %v597_v2  ;;  %v542_v9 = vadd.f32 %v493_v7, %v244_v6  ;;  %v582_v17 = vld [vmem:[#allocation2 + $0x50] sm:$0xff]  ;;  %v524_v18 = vpop.f32.mrf.mxu1 }
 0x100   :  { %v575_v13 = vld [vmem:[#allocation2 + $0x18] sm:$0xff]  ;;  %v495_v15 = vpop.f32.mrf.mxu0  ;;  %643 = vst.msk [vmem:[#allocation3 + $0x48] sm:$0xff] %vm222_vm2, %v627_v12  ;;  %v605_v19 = vmul.f32 %v1036_v20, %v582_v17  ;;  %565 = vst.msk [vmem:[#allocation2 + $0x60] sm:$0xff] %vm222_vm2, %v549_v14 }
 0x101   :  { %636 = vst.msk [vmem:[#allocation3 + $0x10] sm:$0xff] %vm222_vm2, %v620_v8  ;;  %v598_v16 = vmul.f32 %v1036_v20, %v575_v13  ;;  %558 = vst.msk [vmem:[#allocation2 + $0x28] sm:$0xff] %vm222_vm2, %v542_v9  ;;  %v525_v23 = vpop.f32.mrf.mxu1 }
 0x102   :  { %v628_v24 = vadd.f32 %v1041_v26, %v605_v19  ;;  %v550_v27 = vadd.f32 %v525_v23, %v252_v22 }
 0x103   :  { %v621_v21 = vadd.f32 %v1041_v26, %v598_v16  ;;  %v583_v29 = vld [vmem:[#allocation2 + $0x58] sm:$0xff]  ;;  %v527_v30 = vpop.f32.mrf.mxu1 }
 0x104   :  { %v576_v25 = vld [vmem:[#allocation2 + $0x20] sm:$0xff]  ;;  %644 = vst.msk [vmem:[#allocation3 + $0x50] sm:$0xff] %vm222_vm2, %v628_v24  ;;  %v606_v31 = vmul.f32 %v1036_v20, %v583_v29  ;;  %566 = vst.msk [vmem:[#allocation2 + $0x68] sm:$0xff] %vm222_vm2, %v550_v27 }
 0x105   :  { %637 = vst.msk [vmem:[#allocation3 + $0x18] sm:$0xff] %vm222_vm2, %v621_v21  ;;  %v599_v28 = vmul.f32 %v1036_v20, %v576_v25  ;;  %v530_v34 = vpop.f32.mrf.mxu1 }
 0x106   :  { %v629_v35 = vadd.f32 %v1041_v26, %v606_v31  ;;  %v551_v37 = vadd.f32 %v530_v34, %v253_v33 }
 0x107   :  { %v622_v32 = vadd.f32 %v1041_v26, %v599_v28  ;;  %v584_v39 = vld [vmem:[#allocation2 + $0x60] sm:$0xff]  ;;  %v532_v40 = vpop.f32.mrf.mxu1 }
 0x108   :  { %v577_v36 = vld [vmem:[#allocation2 + $0x28] sm:$0xff]  ;;  %645 = vst.msk [vmem:[#allocation3 + $0x58] sm:$0xff] %vm222_vm2, %v629_v35  ;;  %v607_v41 = vmul.f32 %v1036_v20, %v584_v39  ;;  %567 = vst.msk [vmem:[#allocation2 + $0x70] sm:$0xff] %vm222_vm2, %v551_v37 }
 0x109   :  { %638 = vst.msk [vmem:[#allocation3 + $0x20] sm:$0xff] %vm222_vm2, %v622_v32  ;;  %v600_v38 = vmul.f32 %v1036_v20, %v577_v36  ;;  %v533_v44 = vpop.f32.mrf.mxu1 }
 0x10a   :  { %v630_v45 = vadd.f32 %v1041_v26, %v607_v41  ;;  %v552_v46 = vadd.f32 %v533_v44, %v254_v43 }
 0x10b   :  { %v623_v42 = vadd.f32 %v1041_v26, %v600_v38  ;;  %v585_v47 = vld [vmem:[#allocation2 + $0x68] sm:$0xff]  ;;  %v535_v48 = vpop.f32.mrf.mxu1 }
 0x10c   :  { %646 = vst.msk [vmem:[#allocation3 + $0x60] sm:$0xff] %vm222_vm2, %v630_v45  ;;  %v608_v49 = vmul.f32 %v1036_v20, %v585_v47  ;;  %568 = vst.msk [vmem:[#allocation2 + $0x78] sm:$0xff] %vm222_vm2, %v552_v46 }
 0x10d   :  { %639 = vst.msk [vmem:[#allocation3 + $0x28] sm:$0xff] %vm222_vm2, %v623_v42 }
 0x10e   :  { %v631_v50 = vadd.f32 %v1041_v26, %v608_v49 }
 0x10f   :  { %v586_v51 = vld [vmem:[#allocation2 + $0x70] sm:$0xff] }
 0x110   :  { %647 = vst.msk [vmem:[#allocation3 + $0x68] sm:$0xff] %vm222_vm2, %v631_v50  ;;  %v609_v52 = vmul.f32 %v1036_v20, %v586_v51 }
 0x112   :  { %v632_v53 = vadd.f32 %v1041_v26, %v609_v52 }
 0x113   :  { %v587_v54 = vld [vmem:[#allocation2 + $0x78] sm:$0xff] }
 0x114   :  { %648 = vst.msk [vmem:[#allocation3 + $0x70] sm:$0xff] %vm222_vm2, %v632_v53  ;;  %v610_v55 = vmul.f32 %v1036_v20, %v587_v54 }
 0x116   :  { %v633_v56 = vadd.f32 %v1041_v26, %v610_v55 }
 0x118   :  { %649 = vst.msk [vmem:[#allocation3 + $0x78] sm:$0xff] %vm222_vm2, %v633_v56 }
 0x119   :  { %820 = shalt.err (!%p817_p4)
}
 0x11a   :  { %s833_s21 = smov 128   ;;  %s834_s22 = smov 8  }
 0x11b   :  { %661 = dma.vmem_to_hbm [thread:$0]  %s656_s6, 2048, %s1114_s7, [#allocation4], %s833_s21, %s833_s21, %s834_s22  }
 0x11c   :  { %829 = dma.done.wait [#allocation4], 2048  }
 0x11d   :  { %830 = vsyncadd [#allocation4], 4294965248 }
 0x11e   :  { %665 = vsyncpa [#allocation4], 1 }

</bundles_post_ra>
